<compile_context>
chip_gen: v7x
topology: tpu7x:2x2x1
jax: 0.10.0
libtpu: 0.0.40
codegen_flags: <defaults>
</compile_context>

<pallas_src>
import functools

import jax
import jax.numpy as jnp
from jax.experimental import pallas as pl
from jax.experimental.pallas import tpu as pltpu


def _choose_hw_tile(hw, c, itemsize, max_tile=2048, max_bytes=4 << 20):
    """HW tile: multiple of 128 (or the full dim), capped so C*tile*itemsize
    stays well inside scoped VMEM on every TPU generation (v5e/v6e/v7x)."""
    if hw <= 128:
        return hw                                   # full-dim block
    cap = (max_bytes // max(1, c * itemsize)) // 128 * 128
    tile = max(128, min(max_tile, cap))
    return hw if hw <= tile else tile


def _reduce_kernel(w_ref, b_ref, x_ref, g_ref, acc_ref, *, hw, hw_tile, k):
    # w_ref: (K,) conv1d weight in SMEM; b_ref: (1,) bias in SMEM
    # x_ref: (C, hw_tile) input tile; g_ref: (C, 1) gate output (revisited)
    # acc_ref: (C, 1) f32 accumulator scratch (persists across the HW sweep)
    t = pl.program_id(1)
    n_t = pl.num_programs(1)

    @pl.when(t == 0)
    def _():
        acc_ref[...] = jnp.zeros_like(acc_ref)

    x = x_ref[...]                                  # (C, hw_tile), input dtype
    if hw % hw_tile != 0:
        # Remainder tile: zero out the out-of-range lanes so the GAP stays exact.
        lane = jax.lax.broadcasted_iota(jnp.int32, x.shape, 1)
        valid = (t * hw_tile + lane) < hw
        x = jnp.where(valid, x, jnp.zeros_like(x))
    # Accumulate channel sums in f32 without storing a full f32 copy of the tile.
    acc_ref[...] += jnp.sum(x, axis=1, keepdims=True, dtype=jnp.float32)

    @pl.when(t == n_t - 1)
    def _():
        c = acc_ref.shape[0]
        m = acc_ref[...] * jnp.float32(1.0 / hw)    # (C, 1) global average pool
        # Conv1d(1, 1, K, padding=(K-1)//2) along the channel axis (zero pad).
        # Tiny (C+2p, 1) one-shot compute; negligible next to the DMA traffic.
        pad = (k - 1) // 2
        if pad > 0:
            zeros = jnp.zeros((pad, 1), jnp.float32)
            mp = jnp.concatenate([zeros, m, zeros], axis=0)
        else:
            mp = m
        conv = jnp.full((c, 1), b_ref[0], jnp.float32)
        for tap in range(k):                        # K static & small
            conv = conv + w_ref[tap] * mp[tap:tap + c, :]
        # Cast at (C, 1) so the broadcast pass only streams the output dtype.
        g_ref[...] = jax.nn.sigmoid(conv).astype(g_ref.dtype)


def _broadcast_kernel(g_ref, o_ref):
    # g_ref: (C, 1) gate (resident across the HW axis); o_ref: (C, hw_tile)
    o_ref[...] = jnp.broadcast_to(g_ref[...], o_ref.shape)


def eca_attention(x, weight, bias):
    """x: (B, C, H, W); weight: (K,); bias: (1,). Returns (B, C, H, W)."""
    B, C, H, W = x.shape
    K = weight.shape[0]
    HW = H * W
    x2 = x.reshape(B, C, HW)
    hw_tile = _choose_hw_tile(HW, C, x.dtype.itemsize)
    n_hw = pl.cdiv(HW, hw_tile)

    # Pass 1: GAP -> conv1d over channels -> sigmoid -> tiny (B, C, 1) gates.
    gates = pl.pallas_call(
        functools.partial(_reduce_kernel, hw=HW, hw_tile=hw_tile, k=K),
        out_shape=jax.ShapeDtypeStruct((B, C, 1), x.dtype),
        grid=(B, n_hw),
        in_specs=[
            pl.BlockSpec(memory_space=pltpu.SMEM),                   # weight (K,)
            pl.BlockSpec(memory_space=pltpu.SMEM),                   # bias (1,)
            pl.BlockSpec((None, C, hw_tile), lambda b, t: (b, 0, t)),
        ],
        out_specs=pl.BlockSpec((None, C, 1), lambda b, t: (b, 0, 0)),
        scratch_shapes=[pltpu.VMEM((C, 1), jnp.float32)],
        compiler_params=pltpu.CompilerParams(
            dimension_semantics=("parallel", "arbitrary")),
    )(weight, bias, x2)

    # Pass 2: pure store streaming of the broadcast gate; never reads x.
    out = pl.pallas_call(
        _broadcast_kernel,
        out_shape=jax.ShapeDtypeStruct((B, C, HW), x.dtype),
        grid=(B, n_hw),
        in_specs=[pl.BlockSpec((None, C, 1), lambda b, t: (b, 0, 0))],
        out_specs=pl.BlockSpec((None, C, hw_tile), lambda b, t: (b, 0, t)),
        compiler_params=pltpu.CompilerParams(
            dimension_semantics=("parallel", "parallel")),
    )(gates)

    return out.reshape(B, C, H, W)


def eca_reference(x, weight, bias):
    """Pure-JAX reference mirroring the PyTorch forward."""
    m = jnp.mean(x.astype(jnp.float32), axis=(2, 3))         # (B, C) — GAP
    pad = (weight.shape[0] - 1) // 2
    mp = jnp.pad(m, ((0, 0), (pad, pad)))
    C = x.shape[1]
    conv = bias[0] + sum(weight[k] * mp[:, k:k + C] for k in range(weight.shape[0]))
    y = jax.nn.sigmoid(conv).astype(x.dtype)                 # (B, C)
    return jnp.broadcast_to(y[:, :, None, None], x.shape)


def _run_case(key, B, C, H, W, kernel_size=3):
    kx, kw, kb = jax.random.split(key, 3)
    x = jax.random.normal(kx, (B, C, H, W), dtype=jnp.float32)
    bound = 1.0 / (1 * kernel_size) ** 0.5
    weight = jax.random.uniform(kw, (kernel_size,), jnp.float32, -bound, bound)
    bias = jax.random.uniform(kb, (1,), jnp.float32, -bound, bound)

    out = jax.block_until_ready(eca_attention(x, weight, bias))
    ref = eca_reference(x, weight, bias)
    assert out.shape == x.shape and out.dtype == x.dtype
    assert jnp.allclose(out, ref, atol=1e-5, rtol=1e-5)


if __name__ == "__main__":
    key = jax.random.PRNGKey(0)
    k1, k2 = jax.random.split(key)
    # Small shape matching the module spec (single-tile path).
    _run_case(k1, B=2, C=4, H=16, W=16, kernel_size=3)
    # Larger spatial extent to exercise the HW-tiled path with a remainder tile.
    _run_case(k2, B=2, C=8, H=48, W=48, kernel_size=3)
    print("KERNEL_OK")
</pallas_src>

<mosaic_0001>
module attributes {stable_mosaic.version = 11 : i64} {
  func.func @_reduce_kernel(%arg0: i32, %arg1: i32, %arg2: memref<3xf32, #tpu.memory_space<smem>>, %arg3: memref<1xf32, #tpu.memory_space<smem>>, %arg4: memref<1x4x256xf32, #tpu.memory_space<vmem>>, %arg5: memref<1x4x1xf32, #tpu.memory_space<vmem>>, %arg6: memref<4x1xf32, #tpu.memory_space<vmem>>) attributes {dimension_semantics = [#tpu.dimension_semantics<parallel>, #tpu.dimension_semantics<arbitrary>], iteration_bounds = array<i64: 2, 1>, scalar_prefetch = 0 : i64, scratch_operands = 1 : i64, tpu.core_type = #tpu.core_type<tc>, window_params = [{transform_indices = @transform_0, window_bounds = array<i64: 3>}, {transform_indices = @transform_1, window_bounds = array<i64: 1>}, {transform_indices = @transform_2, window_bounds = array<i64: 1, 4, 256>}, {transform_indices = @transform_3, window_bounds = array<i64: 1, 4, 1>}]} {
    %c0_i32 = arith.constant 0 : i32
    %0 = arith.cmpi eq, %arg1, %c0_i32 : i32
    %1 = arith.extui %0 : i1 to i32
    %c0_i32_0 = arith.constant 0 : i32
    %2 = arith.cmpi ne, %1, %c0_i32_0 : i32
    scf.if %2 {
      %cst_9 = arith.constant 0.000000e+00 : f32
      %13 = vector.broadcast %cst_9 : f32 to vector<4x1xf32>
      %c0_10 = arith.constant 0 : index
      %c0_11 = arith.constant 0 : index
      %14 = vector.load %arg6[%c0_10, %c0_11] : memref<4x1xf32, #tpu.memory_space<vmem>>, vector<4x1xf32>
      tpu.vector_store %arg6[%c0_10, %c0_11], %13 {strides = array<i32>} : memref<4x1xf32, #tpu.memory_space<vmem>>, vector<4x1xf32>,
    } else {
    }
    %c0 = arith.constant 0 : index
    %c0_1 = arith.constant 0 : index
    %c0_2 = arith.constant 0 : index
    %3 = vector.load %arg4[%c0, %c0_1, %c0_2] : memref<1x4x256xf32, #tpu.memory_space<vmem>>, vector<1x4x256xf32>
    %4 = vector.shape_cast %3 : vector<1x4x256xf32> to vector<4x256xf32>
    %c0_3 = arith.constant 0 : index
    %c0_4 = arith.constant 0 : index
    %5 = vector.load %arg6[%c0_3, %c0_4] : memref<4x1xf32, #tpu.memory_space<vmem>>, vector<4x1xf32>
    %cst = arith.constant dense<0.000000e+00> : vector<4xf32>
    %6 = vector.multi_reduction <add>, %4, %cst [1] : vector<4x256xf32> to vector<4xf32>
    %7 = vector.shape_cast %6 : vector<4xf32> to vector<4x1xf32>
    %8 = arith.addf %5, %7 : vector<4x1xf32>
    %c0_5 = arith.constant 0 : index
    %c0_6 = arith.constant 0 : index
    %9 = vector.load %arg6[%c0_5, %c0_6] : memref<4x1xf32, #tpu.memory_space<vmem>>, vector<4x1xf32>
    tpu.vector_store %arg6[%c0_5, %c0_6], %8 {strides = array<i32>} : memref<4x1xf32, #tpu.memory_space<vmem>>, vector<4x1xf32>,
    %c0_i32_7 = arith.constant 0 : i32
    %10 = arith.cmpi eq, %arg1, %c0_i32_7 : i32
    %11 = arith.extui %10 : i1 to i32
    %c0_i32_8 = arith.constant 0 : i32
    %12 = arith.cmpi ne, %11, %c0_i32_8 : i32
    scf.if %12 {
      %c0_9 = arith.constant 0 : index
      %c0_10 = arith.constant 0 : index
      %13 = vector.load %arg6[%c0_9, %c0_10] : memref<4x1xf32, #tpu.memory_space<vmem>>, vector<4x1xf32>
      %cst_11 = arith.constant 3.906250e-03 : f32
      %14 = vector.broadcast %cst_11 : f32 to vector<4x1xf32>
      %15 = arith.mulf %13, %14 : vector<4x1xf32>
      %cst_12 = arith.constant 0.000000e+00 : f32
      %16 = vector.broadcast %cst_12 : f32 to vector<1x1xf32>
      %17 = tpu.concatenate %16, %15, %16 in 0 : vector<1x1xf32>, vector<4x1xf32>, vector<1x1xf32> -> vector<6x1xf32>
      %c0_13 = arith.constant 0 : index
      %18 = memref.load %arg3[%c0_13] : memref<1xf32, #tpu.memory_space<smem>>
      %19 = vector.broadcast %18 : f32 to vector<4x1xf32>
      %c0_14 = arith.constant 0 : index
      %20 = memref.load %arg2[%c0_14] : memref<3xf32, #tpu.memory_space<smem>>
      %21 = vector.extract_strided_slice %17 {offsets = [0, 0], sizes = [4, 1], strides = [1, 1]} : vector<6x1xf32> to vector<4x1xf32>
      %22 = vector.broadcast %20 : f32 to vector<4x1xf32>
      %23 = arith.mulf %22, %21 : vector<4x1xf32>
      %24 = arith.addf %19, %23 : vector<4x1xf32>
      %c1 = arith.constant 1 : index
      %25 = memref.load %arg2[%c1] : memref<3xf32, #tpu.memory_space<smem>>
      %26 = vector.extract_strided_slice %17 {offsets = [1, 0], sizes = [4, 1], strides = [1, 1]} : vector<6x1xf32> to vector<4x1xf32>
      %27 = vector.broadcast %25 : f32 to vector<4x1xf32>
      %28 = arith.mulf %27, %26 : vector<4x1xf32>
      %29 = arith.addf %24, %28 : vector<4x1xf32>
      %c2 = arith.constant 2 : index
      %30 = memref.load %arg2[%c2] : memref<3xf32, #tpu.memory_space<smem>>
      %31 = vector.extract_strided_slice %17 {offsets = [2, 0], sizes = [4, 1], strides = [1, 1]} : vector<6x1xf32> to vector<4x1xf32>
      %32 = vector.broadcast %30 : f32 to vector<4x1xf32>
      %33 = arith.mulf %32, %31 : vector<4x1xf32>
      %34 = arith.addf %29, %33 : vector<4x1xf32>
      %35 = arith.negf %34 : vector<4x1xf32>
      %36 = math.exp %35 : vector<4x1xf32>
      %cst_15 = arith.constant 1.000000e+00 : f32
      %37 = vector.broadcast %cst_15 : f32 to vector<4x1xf32>
      %38 = arith.addf %37, %36 : vector<4x1xf32>
      %39 = arith.divf %37, %38 : vector<4x1xf32>
      %c0_16 = arith.constant 0 : index
      %c0_17 = arith.constant 0 : index
      %c0_18 = arith.constant 0 : index
      %40 = vector.load %arg5[%c0_16, %c0_17, %c0_18] : memref<1x4x1xf32, #tpu.memory_space<vmem>>, vector<1x4x1xf32>
      %41 = vector.shape_cast %40 : vector<1x4x1xf32> to vector<4x1xf32>
      %42 = vector.shape_cast %39 : vector<4x1xf32> to vector<1x4x1xf32>
      tpu.vector_store %arg5[%c0_16, %c0_17, %c0_18], %42 {strides = array<i32>} : memref<1x4x1xf32, #tpu.memory_space<vmem>>, vector<1x4x1xf32>,
    } else {
    }
    return
  }
  func.func @transform_0(%arg0: i32, %arg1: i32) -> i32 {
    %c0_i32 = arith.constant 0 : i32
    %c0_i32_0 = arith.constant 0 : i32
    return %c0_i32 : i32
  }
  func.func @transform_1(%arg0: i32, %arg1: i32) -> i32 {
    %c0_i32 = arith.constant 0 : i32
    %c0_i32_0 = arith.constant 0 : i32
    return %c0_i32 : i32
  }
  func.func @transform_2(%arg0: i32, %arg1: i32) -> (i32, i32, i32) {
    %c0_i32 = arith.constant 0 : i32
    %c0_i32_0 = arith.constant 0 : i32
    return %arg0, %c0_i32, %arg1 : i32, i32, i32
  }
  func.func @transform_3(%arg0: i32, %arg1: i32) -> (i32, i32, i32) {
    %c0_i32 = arith.constant 0 : i32
    %c0_i32_0 = arith.constant 0 : i32
    %c0_i32_1 = arith.constant 0 : i32
    return %arg0, %c0_i32, %c0_i32_0 : i32, i32, i32
  }
}

</mosaic_0001>

<bundles_post_ra>
// kernel: tpu_custom_call.1
= control target key start
LH: loop header
LB: loop body
LE: loop exit
PB: predicated region body
PF: predicated region fallthrough
CT: control target
= control target key end

     0   :  { %s732_s0 = inlined_call_operand.vmem [shape: f32[3], index: 0, kind: input, shape index: {}]   ;;  %s733_s1 = inlined_call_operand.<no memory space> [shape: f32[1], index: 1, kind: input, shape index: {}]   ;;  %s734_s2 = inlined_call_operand.hbm [shape: f32[2,4,256], index: 2, kind: input, shape index: {}]   ;;  %s735_s3 = inlined_call_operand.vmem [shape: f32[2,4,1], index: 3, kind: output, shape index: {}]  }
   0x1   :  { %8 = sst [smem:[#allocation3]] %s733_s1 }
   0x2   :  { %9 = vsyncpa [#allocation6], 0 }
   0x3   :  { %10 = vsyncpa [#allocation5], 0 }
   0x4   :  { %12 = vsyncpa [#allocation5 + $0x1], 0  ;;  %s583_s14 = smov 0   ;;  %s585_s15 = smov 0  }
   0x5   :  { %s587_s16 = smov 0   ;;  %s589_s17 = smov 0  }
   0x6   :  { %s591_s18 = smov 0   ;;  %s593_s19 = smov 0  }
   0x7 LB: > { %s366_s1 = sadd.s32 4294967295, %s555_s19   ;;  %p94_p0 = scmp.ne.s32.totalorder %s539_s15, %s535_s14  ;;  %s555_s19 = sphi %s593_s19, %s18_s19   ;;  %s551_s18 = sphi %s591_s18, %s750_s18   ;;  %s547_s17 = sphi %s589_s17, %s749_s17   ;;  %s543_s16 = sphi %s587_s16, %s748_s16   ;;  %s539_s15 = sphi %s585_s15, %s747_s15   ;;  %s535_s14 = sphi %s583_s14, %s746_s14  }
   0x8   : > { %p613_p1 = scmp.eq.s32.totalorder %s366_s1, 0  ;;  %p368_p2 = scmp.ge.s32.totalorder %s555_s19, 1 }
   0x9   : > { %p131_p3 = scmp.lt.s32.totalorder %s555_s19, 3  ;;  %s144_s24 = sshll.u32 %s732_s0, 4  ;;  %s145_s24 = int_to_ptr.vmem [resolvable:$true] %s144_s24 }
   0xa   : > { %s739_s20 = scalar_select %p613_p1, 1, 0 }
   0xb   : > { %p621_p4 = por %p613_p1, %p94_p0  ;;  %p628_p5 = pnand %p368_p2, %p131_p3 }
   0xc   : > { %s30_s27 = sadd.s32 1, %s551_s18  ;;  %s81_s28 = sadd.s32 1, %s543_s16 }
   0xd   : > { %s740_s21 = scalar_select %p621_p4, 1, 0 }
   0xe   : > { %p390_p6 = pneg %p628_p5  ;;  %p32_p8 = scmp.ge.s32.totalorder %s30_s27, 2 }
   0xf   : > { %s456_s29 = scalar_lea.vmem %s145_s24, 16  ;;  %p464_p13 = scmp.lt.s32.totalorder %s145_s24, %s145_s24 }
  0x10   : > { %p636_p7 = pnand %p390_p6, %p613_p1  ;;  %p457_p9 = scmp.ne.s32.totalorder %s145_s24, %s456_s29 }
  0x11   : > { %p465_p0 = scmp.lt.s32.totalorder %s456_s29, %s456_s29 }
  0x12   : > { %p458_p10 = pneg %p636_p7 }
  0x13   : > { %p466_p2 = por %p465_p0, %p464_p13 }
  0x14   : > { %p459_p11 = pnand %p458_p10, %p457_p9 }
  0x16   : > { %p460_p12 = pneg %p459_p11 }
  0x18   : > { %p467_p3 = pnand %p466_p2, %p460_p12 }
  0x1a   : > { %470 = shalt.err (!%p467_p3)
}
  0x1b   : > { %s557_s30 = smov [#allocation4]   ;;  %s752_s27 = smov (%p32_p8, %s30_s27), 0 }
  0x1c   : > { %393 = dma.vmem_to_smem (!%p636_p7), %s145_s24, 16, %s557_s30, [#allocation6]  }
  0x1d   : > { %p88_p6 = scmp.ne.s32.totalorder %s543_s16, %s539_s15  ;;  %p89_p9 = scmp.eq.s32.totalorder %s555_s19, 0 }
  0x1e   : > { %s76_s4 = ssub.s32 %s551_s18, %s752_s27  ;;  %p399_p10 = scmp.lt.s32.totalorder %s555_s19, 2 }
  0x1f   : > { %p79_p11 = scmp.eq.s32.totalorder %s76_s4, 0  ;;  %p90_p12 = por %p89_p9, %p88_p6 }
  0x20   : > { %s158_s5 = sand.u32 1, %s543_s16   ;;  %s383_s6 = sshll.u32 %s551_s18, 7 }
  0x21   : > { %s657_s7 = scalar_select %p79_p11, %s543_s16, %s81_s28  }
  0x22   : > { %s371_s8 = sshll.u32 %s158_s5, 3  ;;  %s662_s11 = scalar_lea.hbm %s734_s2, %s383_s6 }
  0x23   : > { %s162_s12 = scalar_lea.vmem [#allocation7], %s371_s8  ;;  %p664_p7 = pnand %p399_p10, %p90_p12 }
  0x24   : > { %s172_s13 = sshll.u32 %s162_s12, 4  ;;  %s159_s1 = scalar_lea.sflag [#allocation5], %s158_s5  ;;  %s668_s13 = int_to_ptr.vmem [resolvable:$true] %s172_s13 }
  0x25   : > { %s471_s22 = scalar_lea.hbm %s662_s11, 128  ;;  %p473_p13 = pneg %p664_p7 }
  0x26   : > { %p472_p8 = scmp.ne.s32.totalorder %s662_s11, %s471_s22  ;;  %s476_s26 = scalar_lea.hbm %s734_s2, 256 }
  0x27   : > { %p477_p3 = scmp.lt.u32.totalorder %s662_s11, %s734_s2  ;;  %p478_p6 = scmp.lt.u32.totalorder %s476_s26, %s471_s22 }
  0x28   : > { %p474_p0 = pnand %p473_p13, %p472_p8  ;;  %p480_p10 = scmp.lt.u32.totalorder %s471_s22, %s662_s11 }
  0x29   : > { %p479_p9 = por %p478_p6, %p477_p3 }
  0x2a   : > { %p475_p2 = pneg %p474_p0 }
  0x2b   : > { %p481_p11 = por %p480_p10, %p479_p9 }
  0x2d   : > { %p482_p12 = pnand %p481_p11, %p475_p2 }
  0x2f   : > { %485 = shalt.err (!%p482_p12)
}
  0x30   : > { %s486_s30 = scalar_lea.vmem %s668_s13, 128  ;;  %s558_s4 = smov [#allocation7]  }
  0x31   : > { %p487_p8 = scmp.ne.s32.totalorder %s668_s13, %s486_s30  ;;  %s491_s5 = sshll.u32 %s558_s4, 4  ;;  %s492_s5 = int_to_ptr.vmem [resolvable:$false] %s491_s5 }
  0x32   : > { %s493_s6 = scalar_lea.vmem %s492_s5, 256  ;;  %p494_p1 = scmp.lt.s32.totalorder %s668_s13, %s492_s5 }
  0x33   : > { %p489_p0 = pnand %p487_p8, %p473_p13  ;;  %p495_p3 = scmp.lt.s32.totalorder %s493_s6, %s486_s30 }
  0x35   : > { %p490_p4 = pneg %p489_p0  ;;  %p496_p6 = por %p495_p3, %p494_p1 }
  0x37   : > { %p497_p9 = pnand %p496_p6, %p490_p4 }
  0x39   : > { %500 = shalt.err (!%p497_p9)
}
  0x3a   : > { %397 = dma.hbm_to_vmem [thread:$0]  (!%p664_p7), %s662_s11, 128, %s668_s13, %s159_s1  }
  0x3b   : > { %181 = sbr.rel (%p628_p5) target bundleno = 272 (0x110), region = 32  ;;  %p744_p13 = scmp.ne.s32.totalorder (!%p628_p5), %s739_s20, 0 }
  0x42   : > { %526 = dma.done.wait (%p744_p13), [#allocation6], 16  }
  0x43   : > { %528 = vsyncadd (%p744_p13), [#allocation6], 4294967280  ;;  %s187_s8 = sand.u32 1, %s539_s15   ;;  %p745_p1 = scmp.ne.s32.totalorder %s740_s21, 0 }
  0x44   : > { %s376_s9 = sshll.u32 %s187_s8, 3  ;;  %s188_s10 = scalar_lea.sflag [#allocation5], %s187_s8 }
  0x45   : > { %s191_s12 = scalar_lea.vmem [#allocation7], %s376_s9 }
  0x46   : > { %530 = dma.done.wait (%p745_p1), %s188_s10, 128  }
  0x47   : > { %532 = vsyncadd (%p745_p1), %s188_s10, 4294967168 }
  0x48   : > { %196 = sfence }
  0x49   : > { %v225_v0 = vld [vmem:[%s191_s12] sm:$0xff]  ;;  %vm230_vm0 = vcmask 1043456   ;;  %vm223_vm1 = vcmask 3072   ;;  %v559_v3 = vmov 0.0   ;;  %s253_s20 = sld [smem:[#allocation4]]  ;;  %s378_s21 = sld [smem:[#allocation4 + $0x1]] }
  0x4a   : > { %v228_v1 = vcombine.high %v225_v0, %v225_v0  ;;  %v231_v2 = vsel %vm230_vm0, %v225_v0, 0.0  ;;  %224 = vst.msk [vmem:[#allocation2] sm:$0xf] %vm223_vm1, %v559_v3  ;;  %s379_s25 = sld [smem:[#allocation4 + $0x2]]  ;;  %s251_s11 = sld [smem:[#allocation3]]  ;;  %vm247_vm2 = vcmask 1040384  }
  0x4b   : > { %vm249_vm3 = vcmask 1044480   ;;  %p215_p4 = scmp.lt.s32.totalorder %s547_s17, 1 }
  0x4c   : > { %v232_v4 = vsel %vm230_vm0, %v228_v1, 0.0 }
  0x4d   : > { %v233_v5 = vadd.f32 %v232_v4, %v231_v2  ;;  %s754_s17 = smov (!%p215_p4, %s547_s17), 1 }
  0x4e   : > { %s377_s13 = sshll.u32 %s754_s17, 2 }
  0x4f   : > { %234 = vadd.xlane.f32.xlu0 %v233_v5  ;;  %v254_v12 = vstv %s253_s20  ;;  %v258_v13 = vstv %s378_s21  ;;  %s218_s22 = scalar_lea.vmem %s735_s3, %s377_s13 }
  0x50   : > { %v265_v14 = vstv %s379_s25  ;;  %v252_v17 = vstv %s251_s11 }
  0x51   : > { %v226_v6 = vld [vmem:[#allocation2] sm:$0xf] }
  0xdc   : > { %v235_v7 = vpop.xlane.xlu0 %234 }
  0xdd   : > { %v236_v8 = vadd.f32 %v235_v7, %v226_v6 }
  0xdf   : > { %238 = vst.msk [vmem:[#allocation2] sm:$0xf] %vm223_vm1, %v236_v8 }
  0xe6   : > { %v242_v9 = vld [vmem:[#allocation2] sm:$0xf] }
  0xe7   : > { %v243_v10 = vmul.f32 0.00390625, %v242_v9 }
  0xe9   : > { %v245_v11 = vrot.slane %v243_v10, 7 }
  0xeb   : > { %v248_v15 = vsel %vm247_vm2, 0.0, %v245_v11 }
  0xec   : > { %v250_v16 = vsel %vm249_vm3, %v248_v15, 0.0 }
  0xed   : > { %v255_v18 = vmul.f32 %v254_v12, %v250_v16  ;;  %v259_v19 = vmul.f32 %v258_v13, %v250_v16  ;;  %v266_v20 = vmul.f32 %v265_v14, %v250_v16 }
  0xef   : > { %v256_v21 = vadd.f32 %v255_v18, %v252_v17  ;;  %v261_v22 = vrot.slane %v259_v19, 1  ;;  %v268_v24 = vrot.slane %v266_v20, 2 }
  0xf1   : > { %v263_v23 = vadd.f32 %v261_v22, %v256_v21 }
  0xf3   : > { %v270_v25 = vadd.f32 %v268_v24, %v263_v23 }
  0xf5   : > { %v380_v26 = vmul.f32 -1.442695, %v270_v25 }
  0xf7   : > { %452 = vpow2.f32 %v380_v26 }
 0x101   : > { %v453_v27 = vpop.eup %452 }
 0x102   : > { %v274_v28 = vadd.f32 1.0, %v453_v27 }
 0x104   : > { %454 = vrcp.f32 %v274_v28 }
 0x10e   : > { %v455_v29 = vpop.eup %454 }
 0x10f   : > { %277 = vst.msk [vmem:[%s218_s22] sm:$0xf] %vm223_vm1, %v455_v29 }
 0x110 PF: > { %s18_s19 = sadd.s32 1, %s555_s19   ;;  %s746_s14 = smov %s539_s15 }
 0x111   : > { %p15_p5 = scmp.ge.s32.totalorder %s18_s19, 4   ;;  %s747_s15 = smov %s543_s16 }
 0x112   : > { %s748_s16 = smov %s657_s7  ;;  %s749_s17 = smov %s551_s18 }
 0x113   : > { %s750_s18 = smov %s752_s27  ;;  %17 = sbr.rel (!%p15_p5) target bundleno = 7 (0x7), region = 85 }
 0x11a   :  { %297 = vsyncpa [#allocation5], 1 }
 0x11b   :  { %299 = vsyncpa [#allocation5 + $0x1], 1 }
 0x11c   :  { %300 = vsyncpa [#allocation6], 1 }
 0x11d   :  { %302 = vsyncpa [#allocation6 + $0x1], 1 }

</bundles_post_ra>
